<compile_context>
chip_gen: v7x
topology: tpu7x:2x2x1
jax: 0.10.0
libtpu: 0.0.40
codegen_flags: <defaults>
</compile_context>

<pallas_src>
import functools
import math

import jax
import jax.numpy as jnp
from jax.experimental import pallas as pl
from jax.experimental.pallas import tpu as pltpu

LANE = 128            # TPU lane width: last-dim tiles must be multiples of 128
BF16_SUBLANE = 16     # bf16 sublane packing
DEFAULT_TILE_B = 1024
MIN_GRID_STEPS = 2    # aim for >= 2 grid steps (v7x dual TensorCore / pipelining)


def _round_up(x, m):
    return (x + m - 1) // m * m


def _vmem_capacity_bytes():
    """Generation-aware VMEM capacity (128 MiB on v5e/v6e, 64 MiB/TC on v7x)."""
    try:
        return int(pltpu.get_tpu_info().vmem_capacity_bytes)
    except Exception:
        return 128 << 20


def _resident_spec(shape):
    """BlockSpec for a parameter that stays VMEM-resident across the batch grid.

    Constant index_map => the block never changes, so a single buffer suffices
    (pl.Buffered(1)); falls back to default double-buffering if the kwarg is
    unavailable.
    """
    try:
        return pl.BlockSpec(shape, lambda i: (0, 0), pipeline_mode=pl.Buffered(1))
    except TypeError:
        return pl.BlockSpec(shape, lambda i: (0, 0))


def _make_mlp_kernel(num_hidden, bias_slices):
    """Fused MLP kernel.

    Ref layout:
      (x[bf16], w_0..w_{H-1}[bf16], w_last[f32 (1,Hpad)], b_cat[f32 (1,ΣHpad)],
       b_last[f32 (1,1) SMEM], o[f32 (TB,1)]).
    Hidden layers: MXU matmul (bf16 inputs, f32 accumulation) + f32 bias/ReLU,
    activations carried bf16. Final out_features==1 layer: VPU multiply +
    lane reduce (keeps the lane-width-1 matmul off the MXU).
    """

    def kernel(*refs):
        x_ref = refs[0]
        w_refs = refs[1:1 + num_hidden]
        w_last_ref = refs[1 + num_hidden]
        b_ref = refs[2 + num_hidden]
        b_last_ref = refs[3 + num_hidden]
        o_ref = refs[4 + num_hidden]

        h = x_ref[...]                                              # bf16, no up-cast
        for i in range(num_hidden):
            off, width = bias_slices[i]
            b = b_ref[:, off:off + width]                           # (1, width) f32
            acc = jnp.dot(h, w_refs[i][...],
                          preferred_element_type=jnp.float32)       # MXU, f32 accum
            h = jnp.maximum(acc + b, 0.0).astype(jnp.bfloat16)      # bias+ReLU, bf16 carry

        # Final Linear(current_dim, 1): elementwise multiply (VPU) + lane reduce (XLU).
        w_last = w_last_ref[...]                                    # (1, H_pad) f32
        r = jnp.sum(h.astype(jnp.float32) * w_last,
                    axis=-1, keepdims=True)                         # (TB, 1) f32
        o_ref[...] = (r + b_last_ref[0, 0]).astype(o_ref.dtype)     # scalar bias from SMEM

    return kernel


def init_flexible_network_params(key, input_dim, hidden_layers):
    """Deterministic init matching nn.Linear default U(-1/sqrt(fan_in), +1/sqrt(fan_in)).

    Weights stored as (in_features, out_features) — transpose of PyTorch layout,
    same math (h @ W + b).
    """
    dims = [input_dim] + list(hidden_layers) + [1]
    params = []
    for i in range(len(dims) - 1):
        fan_in, fan_out = dims[i], dims[i + 1]
        key, kw, kb = jax.random.split(key, 3)
        bound = 1.0 / math.sqrt(fan_in)
        w = jax.random.uniform(kw, (fan_in, fan_out), jnp.float32, -bound, bound)
        b = jax.random.uniform(kb, (1, fan_out), jnp.float32, -bound, bound)
        params.append((w, b))
    return params


def pack_flexible_network_params(params):
    """Pad all dims to lane multiples (128) and pack for the kernel.

    Hidden weights -> bf16 (MXU fast path, halves VMEM residency). The final
    (H, 1) weight is kept f32 as a (1, H_pad) row for the VPU reduce. Hidden
    biases are concatenated into a single lane-aligned (1, Σpad) f32 array; the
    final scalar bias is a (1, 1) f32 array that goes to SMEM.
    Zero padding is exact: padded weight rows/cols and biases are 0, ReLU(0)=0.
    """
    padded_ws = []
    bias_segs = []
    bias_slices = []
    off = 0
    for w, b in params[:-1]:
        fan_in, fan_out = w.shape
        in_pad = _round_up(fan_in, LANE)
        out_pad = _round_up(fan_out, LANE)
        wp = jnp.zeros((in_pad, out_pad), jnp.float32).at[:fan_in, :fan_out].set(w)
        padded_ws.append(wp.astype(jnp.bfloat16))
        bp = jnp.zeros((1, out_pad), jnp.float32).at[:, :fan_out].set(b.reshape(1, -1))
        bias_segs.append(bp)
        bias_slices.append((off, out_pad))
        off += out_pad

    w_last, b_last = params[-1]
    h_pad = _round_up(w_last.shape[0], LANE)
    w_last_p = jnp.zeros((1, h_pad), jnp.float32).at[:, :w_last.shape[0]].set(
        w_last.reshape(1, -1))
    b_last_p = jnp.asarray(b_last, jnp.float32).reshape(1, 1)

    if bias_segs:
        b_cat = jnp.concatenate(bias_segs, axis=1)
    else:
        b_cat = jnp.zeros((1, LANE), jnp.float32)   # unused placeholder
    return tuple(padded_ws), w_last_p, b_cat, b_last_p, tuple(bias_slices)


@functools.partial(jax.jit, static_argnames=("bias_slices", "tile_b"))
def _run_kernel(x_pad, padded_ws, w_last_p, b_cat, b_last_p, bias_slices, tile_b):
    b_pad, f_pad = x_pad.shape
    num_hidden = len(padded_ws)
    grid = (b_pad // tile_b,)

    kernel = _make_mlp_kernel(num_hidden, bias_slices)

    in_specs = [pl.BlockSpec((tile_b, f_pad), lambda i: (i, 0))]     # x: batch-tiled, bf16
    for w in padded_ws:                                              # weights: VMEM-resident
        in_specs.append(_resident_spec(w.shape))
    in_specs.append(_resident_spec(w_last_p.shape))
    in_specs.append(_resident_spec(b_cat.shape))
    in_specs.append(pl.BlockSpec(memory_space=pltpu.MemorySpace.SMEM))  # final scalar bias
    out_specs = pl.BlockSpec((tile_b, 1), lambda i: (i, 0))

    # VMEM budget: double-buffered x/out tiles + single-buffered resident params + slack,
    # capped at the device's capacity minus headroom (generation-aware).
    x_tile_bytes = tile_b * f_pad * 2                      # bf16 input tile
    out_tile_bytes = tile_b * 512                          # (tile_b,1) f32 block, lane-padded
    param_bytes = (sum(int(w.size) * 2 for w in padded_ws)
                   + int(w_last_p.size) * 4 + int(b_cat.size) * 4)
    needed = 2 * (x_tile_bytes + out_tile_bytes) + param_bytes + (8 << 20)
    usable = max(_vmem_capacity_bytes() - (16 << 20), 32 << 20)
    vmem_limit = int(min(needed, usable))

    # Advisory cost estimate for XLA scheduling.
    flops = 0
    for w in padded_ws:
        flops += 2 * b_pad * int(w.shape[0]) * int(w.shape[1])
    flops += 2 * b_pad * int(w_last_p.shape[1])
    bytes_accessed = int(x_pad.size) * 2 + param_bytes + b_pad * 4

    return pl.pallas_call(
        kernel,
        out_shape=jax.ShapeDtypeStruct((b_pad, 1), jnp.float32),
        grid=grid,
        in_specs=in_specs,
        out_specs=out_specs,
        compiler_params=pltpu.CompilerParams(
            dimension_semantics=("parallel",),
            vmem_limit_bytes=vmem_limit,
        ),
        cost_estimate=pl.CostEstimate(
            flops=flops, transcendentals=0, bytes_accessed=bytes_accessed),
    )(x_pad, *padded_ws, w_last_p, b_cat, b_last_p)


def flexible_network_forward(x, packed, tile_b=DEFAULT_TILE_B,
                             min_grid_steps=MIN_GRID_STEPS):
    """Forward pass of FlexibleNetwork (eval mode). x: (B, input_dim) float32."""
    padded_ws, w_last_p, b_cat, b_last_p, bias_slices = packed
    batch, input_dim = x.shape
    f_pad = padded_ws[0].shape[0] if padded_ws else w_last_p.shape[1]

    # Batch tile: <= tile_b rows, bf16-sublane (16) aligned, and small enough
    # that the grid has >= min_grid_steps steps when the batch allows it
    # (v7x dual-TC sharding + DMA/compute overlap).
    tb = min(int(tile_b), _round_up(max(1, -(-batch // min_grid_steps)), BF16_SUBLANE))
    tb = max(_round_up(tb, BF16_SUBLANE), BF16_SUBLANE)
    b_pad = _round_up(batch, tb)

    # Stream x as bf16: the first matmul consumes bf16 anyway, so this is
    # numerically identical but halves input HBM traffic and VMEM footprint.
    x_pad = jnp.zeros((b_pad, f_pad), jnp.bfloat16).at[:batch, :input_dim].set(
        x.astype(jnp.bfloat16))
    out = _run_kernel(x_pad, padded_ws, w_last_p, b_cat, b_last_p, bias_slices, tb)
    return out[:batch]                                      # (B, 1)


def _reference_forward_bf16(x, params):
    """Reference matching the kernel's math (bf16 inputs, f32 accumulate)."""
    h = x.astype(jnp.bfloat16)
    for w, b in params[:-1]:
        h = jnp.dot(h, w.astype(jnp.bfloat16),
                    preferred_element_type=jnp.float32) + b
        h = jnp.maximum(h, 0.0).astype(jnp.bfloat16)
    w_last, b_last = params[-1]
    return h.astype(jnp.float32) @ w_last + b_last


def _reference_forward_f32(x, params):
    """True f32 semantics of the PyTorch module (eval mode)."""
    h = x.astype(jnp.float32)
    for w, b in params[:-1]:
        h = jnp.maximum(h @ w + b, 0.0)
    w_last, b_last = params[-1]
    return h @ w_last + b_last


if __name__ == "__main__":
    key = jax.random.PRNGKey(0)
    k_in, k_param = jax.random.split(key)

    batch = 8
    input_dim = 16
    hidden_layers = [32, 32]

    x = jax.random.normal(k_in, (batch, input_dim), jnp.float32)
    params = init_flexible_network_params(k_param, input_dim, hidden_layers)
    packed = pack_flexible_network_params(params)

    out = flexible_network_forward(x, packed)
    out = jax.block_until_ready(out)

    assert out.shape == (batch, 1), out.shape
    ref_bf16 = _reference_forward_bf16(x, params)
    ref_f32 = _reference_forward_f32(x, params)
    # Exact-ish match against the bf16-input / f32-accumulate semantics the kernel uses.
    assert jnp.allclose(out, ref_bf16, atol=1e-3, rtol=1e-3), (out, ref_bf16)
    # Loose check against true f32 PyTorch semantics (bf16 is a deliberate fidelity trade).
    assert jnp.allclose(out, ref_f32, atol=5e-2, rtol=5e-2), (out, ref_f32)

    print("KERNEL_OK")
</pallas_src>

<mosaic_0001>
module attributes {stable_mosaic.version = 11 : i64} {
  func.func @kernel(%arg0: i32, %arg1: memref<16x128xbf16, #tpu.memory_space<vmem>>, %arg2: memref<128x128xbf16, #tpu.memory_space<vmem>>, %arg3: memref<128x128xbf16, #tpu.memory_space<vmem>>, %arg4: memref<1x128xf32, #tpu.memory_space<vmem>>, %arg5: memref<1x256xf32, #tpu.memory_space<vmem>>, %arg6: memref<1x1xf32, #tpu.memory_space<smem>>, %arg7: memref<16x1xf32, #tpu.memory_space<vmem>>) attributes {dimension_semantics = [#tpu.dimension_semantics<parallel>], iteration_bounds = array<i64: 1>, scalar_prefetch = 0 : i64, scratch_operands = 0 : i64, tpu.core_type = #tpu.core_type<tc>, window_params = [{transform_indices = @transform_0, window_bounds = array<i64: 16, 128>}, {pipeline_mode = #tpu.pipeline_mode<synchronous>, transform_indices = @transform_1, window_bounds = array<i64: 128, 128>}, {pipeline_mode = #tpu.pipeline_mode<synchronous>, transform_indices = @transform_2, window_bounds = array<i64: 128, 128>}, {pipeline_mode = #tpu.pipeline_mode<synchronous>, transform_indices = @transform_3, window_bounds = array<i64: 1, 128>}, {pipeline_mode = #tpu.pipeline_mode<synchronous>, transform_indices = @transform_4, window_bounds = array<i64: 1, 256>}, {transform_indices = @transform_5, window_bounds = array<i64: 1, 1>}, {transform_indices = @transform_6, window_bounds = array<i64: 16, 1>}]} {
    %c0 = arith.constant 0 : index
    %c0_0 = arith.constant 0 : index
    %0 = vector.load %arg1[%c0, %c0_0] : memref<16x128xbf16, #tpu.memory_space<vmem>>, vector<16x128xbf16>
    %c0_1 = arith.constant 0 : index
    %c0_2 = arith.constant 0 : index
    %1 = vector.load %arg5[%c0_1, %c0_2] : memref<1x256xf32, #tpu.memory_space<vmem>>, vector<1x128xf32>
    %c0_3 = arith.constant 0 : index
    %c0_4 = arith.constant 0 : index
    %2 = vector.load %arg2[%c0_3, %c0_4] : memref<128x128xbf16, #tpu.memory_space<vmem>>, vector<128x128xbf16>
    %cst = arith.constant dense<0.000000e+00> : vector<16x128xf32>
    %3 = tpu.matmul %0, %2, %cst {dimension_numbers = #tpu.dot_dimension_numbers<[1], [0], [0], [1], [0, 0, 1, 1], [], []>} : vector<16x128xbf16>, vector<128x128xbf16>, vector<16x128xf32> -> vector<16x128xf32>
    %4 = vector.broadcast %1 : vector<1x128xf32> to vector<16x128xf32>
    %5 = arith.addf %3, %4 : vector<16x128xf32>
    %cst_5 = arith.constant 0.000000e+00 : f32
    %6 = vector.broadcast %cst_5 : f32 to vector<16x128xf32>
    %7 = arith.maximumf %5, %6 : vector<16x128xf32>
    %8 = arith.truncf %7 : vector<16x128xf32> to vector<16x128xbf16>
    %c0_6 = arith.constant 0 : index
    %c128 = arith.constant 128 : index
    %9 = vector.load %arg5[%c0_6, %c128] : memref<1x256xf32, #tpu.memory_space<vmem>>, vector<1x128xf32>
    %c0_7 = arith.constant 0 : index
    %c0_8 = arith.constant 0 : index
    %10 = vector.load %arg3[%c0_7, %c0_8] : memref<128x128xbf16, #tpu.memory_space<vmem>>, vector<128x128xbf16>
    %cst_9 = arith.constant dense<0.000000e+00> : vector<16x128xf32>
    %11 = tpu.matmul %8, %10, %cst_9 {dimension_numbers = #tpu.dot_dimension_numbers<[1], [0], [0], [1], [0, 0, 1, 1], [], []>} : vector<16x128xbf16>, vector<128x128xbf16>, vector<16x128xf32> -> vector<16x128xf32>
    %12 = vector.broadcast %9 : vector<1x128xf32> to vector<16x128xf32>
    %13 = arith.addf %11, %12 : vector<16x128xf32>
    %cst_10 = arith.constant 0.000000e+00 : f32
    %14 = vector.broadcast %cst_10 : f32 to vector<16x128xf32>
    %15 = arith.maximumf %13, %14 : vector<16x128xf32>
    %16 = arith.truncf %15 : vector<16x128xf32> to vector<16x128xbf16>
    %c0_11 = arith.constant 0 : index
    %c0_12 = arith.constant 0 : index
    %17 = vector.load %arg4[%c0_11, %c0_12] : memref<1x128xf32, #tpu.memory_space<vmem>>, vector<1x128xf32>
    %18 = arith.extf %16 : vector<16x128xbf16> to vector<16x128xf32>
    %19 = vector.broadcast %17 : vector<1x128xf32> to vector<16x128xf32>
    %20 = arith.mulf %18, %19 : vector<16x128xf32>
    %cst_13 = arith.constant dense<0.000000e+00> : vector<16xf32>
    %21 = vector.multi_reduction <add>, %20, %cst_13 [1] : vector<16x128xf32> to vector<16xf32>
    %22 = vector.shape_cast %21 : vector<16xf32> to vector<16x1xf32>
    %c0_14 = arith.constant 0 : index
    %c0_15 = arith.constant 0 : index
    %23 = memref.load %arg6[%c0_14, %c0_15] : memref<1x1xf32, #tpu.memory_space<smem>>
    %24 = vector.broadcast %23 : f32 to vector<16x1xf32>
    %25 = arith.addf %22, %24 : vector<16x1xf32>
    %c0_16 = arith.constant 0 : index
    %c0_17 = arith.constant 0 : index
    %26 = vector.load %arg7[%c0_16, %c0_17] : memref<16x1xf32, #tpu.memory_space<vmem>>, vector<16x1xf32>
    tpu.vector_store %arg7[%c0_16, %c0_17], %25 {strides = array<i32>} : memref<16x1xf32, #tpu.memory_space<vmem>>, vector<16x1xf32>,
    return
  }
  func.func @transform_0(%arg0: i32) -> (i32, i32) {
    %c0_i32 = arith.constant 0 : i32
    %c0_i32_0 = arith.constant 0 : i32
    return %arg0, %c0_i32 : i32, i32
  }
  func.func @transform_1(%arg0: i32) -> (i32, i32) {
    %c0_i32 = arith.constant 0 : i32
    %c0_i32_0 = arith.constant 0 : i32
    %c0_i32_1 = arith.constant 0 : i32
    return %c0_i32, %c0_i32_0 : i32, i32
  }
  func.func @transform_2(%arg0: i32) -> (i32, i32) {
    %c0_i32 = arith.constant 0 : i32
    %c0_i32_0 = arith.constant 0 : i32
    %c0_i32_1 = arith.constant 0 : i32
    return %c0_i32, %c0_i32_0 : i32, i32
  }
  func.func @transform_3(%arg0: i32) -> (i32, i32) {
    %c0_i32 = arith.constant 0 : i32
    %c0_i32_0 = arith.constant 0 : i32
    %c0_i32_1 = arith.constant 0 : i32
    return %c0_i32, %c0_i32_0 : i32, i32
  }
  func.func @transform_4(%arg0: i32) -> (i32, i32) {
    %c0_i32 = arith.constant 0 : i32
    %c0_i32_0 = arith.constant 0 : i32
    %c0_i32_1 = arith.constant 0 : i32
    return %c0_i32, %c0_i32_0 : i32, i32
  }
  func.func @transform_5(%arg0: i32) -> (i32, i32) {
    %c0_i32 = arith.constant 0 : i32
    %c0_i32_0 = arith.constant 0 : i32
    %c0_i32_1 = arith.constant 0 : i32
    return %c0_i32, %c0_i32_0 : i32, i32
  }
  func.func @transform_6(%arg0: i32) -> (i32, i32) {
    %c0_i32 = arith.constant 0 : i32
    %c0_i32_0 = arith.constant 0 : i32
    return %arg0, %c0_i32 : i32, i32
  }
}

</mosaic_0001>

<bundles_post_ra>
// kernel: _run_kernel.1
= control target key start
LH: loop header
LB: loop body
LE: loop exit
PB: predicated region body
PF: predicated region fallthrough
CT: control target
= control target key end

     0   :  { %12 = vsyncpa [#allocation4], 0  ;;  %s616_s0 = inlined_call_operand.hbm [shape: bf16[16,128], index: 0, kind: input, shape index: {}]   ;;  %s617_s1 = inlined_call_operand.hbm [shape: bf16[128,128], index: 1, kind: input, shape index: {}]   ;;  %s618_s2 = inlined_call_operand.hbm [shape: bf16[128,128], index: 2, kind: input, shape index: {}]   ;;  %s619_s3 = inlined_call_operand.vmem [shape: f32[1,128], index: 3, kind: input, shape index: {}]   ;;  %s620_s4 = inlined_call_operand.vmem [shape: f32[1,256], index: 4, kind: input, shape index: {}]   ;;  %s621_s5 = inlined_call_operand.<no memory space> [shape: f32[1,1], index: 5, kind: input, shape index: {}]   ;;  %s622_s6 = inlined_call_operand.vmem [shape: f32[16,1], index: 6, kind: output, shape index: {}]  }
   0x1   :  { %13 = vsyncpa [#allocation6], 0  ;;  %s504_s21 = smov [#allocation5]   ;;  %s505_s23 = smov [#allocation3]  }
   0x2   :  { %s31_s22 = sshll.u32 %s504_s21, 4  ;;  %s19_s24 = sshll.u32 %s505_s23, 4  ;;  %s32_s22 = int_to_ptr.vmem [resolvable:$true] %s31_s22  ;;  %s546_s24 = int_to_ptr.vmem [resolvable:$true] %s19_s24 }
   0x3   :  { %s434_s27 = scalar_lea.hbm %s617_s1, 1024 }
   0x4   :  { %p435_p0 = scmp.ne.s32.totalorder %s617_s1, %s434_s27  ;;  %p438_p1 = scmp.lt.u32.totalorder %s434_s27, %s617_s1 }
   0x6   :  { %p440_p2 = pnand %p438_p1, %p435_p0 }
   0x8   :  { %443 = shalt.err (!%p440_p2)
}
   0x9   :  { %s444_s8 = scalar_lea.vmem %s32_s22, 1024  ;;  %p449_p4 = scmp.lt.s32.totalorder %s32_s22, %s32_s22 }
   0xa   :  { %p445_p3 = scmp.ne.s32.totalorder %s32_s22, %s444_s8  ;;  %p450_p5 = scmp.lt.s32.totalorder %s444_s8, %s444_s8 }
   0xc   :  { %p451_p6 = por %p450_p5, %p449_p4 }
   0xe   :  { %p452_p7 = pnand %p451_p6, %p445_p3 }
  0x10   :  { %455 = shalt.err (!%p452_p7)
}
  0x11   :  { %s506_s9 = smov 64   ;;  %s507_s10 = smov 4  }
  0x12   :  { %37 = dma.hbm_to_vmem [thread:$0]  %s617_s1, 1024, %s32_s22, [#allocation6], %s506_s9, %s506_s9, %s507_s10  }
  0x13   :  { %s456_s15 = scalar_lea.hbm %s616_s0, 128 }
  0x14   :  { %p457_p8 = scmp.ne.s32.totalorder %s616_s0, %s456_s15  ;;  %p460_p9 = scmp.lt.u32.totalorder %s456_s15, %s616_s0 }
  0x16   :  { %p462_p10 = pnand %p460_p9, %p457_p8 }
  0x18   :  { %465 = shalt.err (!%p462_p10)
}
  0x19   :  { %s466_s20 = scalar_lea.vmem %s546_s24, 128  ;;  %p471_p12 = scmp.lt.s32.totalorder %s546_s24, %s546_s24 }
  0x1a   :  { %p467_p11 = scmp.ne.s32.totalorder %s546_s24, %s466_s20  ;;  %p472_p13 = scmp.lt.s32.totalorder %s466_s20, %s466_s20 }
  0x1c   :  { %p473_p0 = por %p472_p13, %p471_p12 }
  0x1e   :  { %p474_p1 = pnand %p473_p0, %p467_p11 }
  0x20   :  { %477 = shalt.err (!%p474_p1)
}
  0x21   :  { %25 = dma.hbm_to_vmem [thread:$0]  %s616_s0, 128, %s546_s24, [#allocation4], %s506_s9, %s506_s9, %s507_s10  }
  0x22   :  { %s508_s22 = smov [#allocation7]   ;;  %s478_s27 = scalar_lea.hbm %s618_s2, 1024 }
  0x23   :  { %s43_s23 = sshll.u32 %s508_s22, 4  ;;  %p479_p2 = scmp.ne.s32.totalorder %s618_s2, %s478_s27  ;;  %s44_s23 = int_to_ptr.vmem [resolvable:$true] %s43_s23 }
  0x24   :  { %p482_p3 = scmp.lt.u32.totalorder %s478_s27, %s618_s2 }
  0x26   :  { %p484_p4 = pnand %p482_p3, %p479_p2 }
  0x28   :  { %487 = shalt.err (!%p484_p4)
}
  0x29   :  { %s488_s8 = scalar_lea.vmem %s44_s23, 1024  ;;  %p493_p6 = scmp.lt.s32.totalorder %s44_s23, %s44_s23 }
  0x2a   :  { %p489_p5 = scmp.ne.s32.totalorder %s44_s23, %s488_s8  ;;  %p494_p7 = scmp.lt.s32.totalorder %s488_s8, %s488_s8 }
  0x2c   :  { %p495_p8 = por %p494_p7, %p493_p6 }
  0x2e   :  { %p496_p9 = pnand %p495_p8, %p489_p5 }
  0x30   :  { %499 = shalt.err (!%p496_p9)
}
  0x31   :  { %49 = dma.hbm_to_vmem [thread:$0]  %s618_s2, 1024, %s44_s23, [#allocation6], %s506_s9, %s506_s9, %s507_s10  }
  0x32   :  { %500 = dma.done.wait [#allocation4], 128  }
  0x33   :  { %501 = vsyncadd [#allocation4], 4294967168 }
  0x34   :  { %502 = dma.done.wait [#allocation6], 2048  }
  0x35   :  { %503 = vsyncadd [#allocation6], 4294965248  ;;  %v509_v0 = vmov 0.0   ;;  %vm510_vm0 = vmmov 0   ;;  %v417_v1 = vld [vmem:[#allocation5] sm:$0xff]   ;;  %v418_v2 = vld [vmem:[#allocation5 + $0x8] sm:$0xff]   ;;  %v320_v43 = vstv %s621_s5 }
  0x36   :  { %370 = vmatprep.subr.bf16.mxu0 %v509_v0  ;;  %386 = vmatprep.mubr.msk.bf16.mxu0 %vm510_vm0, %v509_v0  ;;  %v419_v3 = vld [vmem:[#allocation5 + $0x10] sm:$0xff]   ;;  %v426_v4 = vld [vmem:[#allocation7] sm:$0xff]   ;;  %v420_v5 = vld [vmem:[#allocation5 + $0x18] sm:$0xff]   ;;  %vm323_vm1 = vcmask 7168  }
  0x37   :  { %390 = vmatprep.subr.bf16.mxu1 %v509_v0  ;;  %406 = vmatprep.mubr.msk.bf16.mxu1 %vm510_vm0, %v509_v0  ;;  %v427_v6 = vld [vmem:[#allocation7 + $0x8] sm:$0xff]   ;;  %v421_v7 = vld [vmem:[#allocation5 + $0x20] sm:$0xff]   ;;  %v428_v8 = vld [vmem:[#allocation7 + $0x10] sm:$0xff]  }
  0x38   :  { %371 = vmatpush3.bf16.msra.mxu0 %v417_v1  ;;  %391 = vmatpush3.bf16.msra.mxu1 %v426_v4  ;;  %v422_v9 = vld [vmem:[#allocation5 + $0x28] sm:$0xff]   ;;  %v429_v10 = vld [vmem:[#allocation7 + $0x18] sm:$0xff]   ;;  %v423_v11 = vld [vmem:[#allocation5 + $0x30] sm:$0xff]  }
  0x39   :  { %372 = vmatprep.subr.bf16.mxu0 %v509_v0  ;;  %392 = vmatprep.subr.bf16.mxu1 %v509_v0  ;;  %v430_v12 = vld [vmem:[#allocation7 + $0x20] sm:$0xff]   ;;  %v424_v13 = vld [vmem:[#allocation5 + $0x38] sm:$0xff]   ;;  %v431_v14 = vld [vmem:[#allocation7 + $0x28] sm:$0xff]  }
  0x3a   :  { %v425_v15 = vld [vmem:[#allocation3] sm:$0xff]   ;;  %v432_v16 = vld [vmem:[#allocation7 + $0x30] sm:$0xff]  }
  0x3b   :  { %v433_v17 = vld [vmem:[#allocation7 + $0x38] sm:$0xff]  }
  0x3c   :  { %373 = vmatpush3.bf16.msra.mxu0 %v418_v2  ;;  %393 = vmatpush3.bf16.msra.mxu1 %v427_v6  ;;  %v332_v18 = vld [vmem:[%s620_s4] ss:$0 sm:$0xff]  ;;  %v342_v28 = vld [vmem:[%s620_s4 + $0x1] ss:$0 sm:$0xff] }
  0x3d   :  { %374 = vmatprep.subr.bf16.mxu0 %v509_v0  ;;  %394 = vmatprep.subr.bf16.mxu1 %v509_v0  ;;  %v351_v38 = vld [vmem:[%s619_s3] ss:$0 sm:$0xff] }
  0x40   :  { %375 = vmatpush3.bf16.msra.mxu0 %v419_v3  ;;  %395 = vmatpush3.bf16.msra.mxu1 %v428_v8 }
  0x41   :  { %376 = vmatprep.subr.bf16.mxu0 %v509_v0  ;;  %396 = vmatprep.subr.bf16.mxu1 %v509_v0 }
  0x44   :  { %377 = vmatpush3.bf16.msra.mxu0 %v420_v5  ;;  %397 = vmatpush3.bf16.msra.mxu1 %v429_v10 }
  0x45   :  { %378 = vmatprep.subr.bf16.mxu0 %v509_v0  ;;  %398 = vmatprep.subr.bf16.mxu1 %v509_v0 }
  0x48   :  { %379 = vmatpush3.bf16.msra.mxu0 %v421_v7  ;;  %399 = vmatpush3.bf16.msra.mxu1 %v430_v12 }
  0x49   :  { %380 = vmatprep.subr.bf16.mxu0 %v509_v0  ;;  %400 = vmatprep.subr.bf16.mxu1 %v509_v0 }
  0x4c   :  { %381 = vmatpush3.bf16.msra.mxu0 %v422_v9  ;;  %401 = vmatpush3.bf16.msra.mxu1 %v431_v14 }
  0x4d   :  { %382 = vmatprep.subr.bf16.mxu0 %v509_v0  ;;  %402 = vmatprep.subr.bf16.mxu1 %v509_v0 }
  0x50   :  { %383 = vmatpush3.bf16.msra.mxu0 %v423_v11  ;;  %403 = vmatpush3.bf16.msra.mxu1 %v432_v16 }
  0x51   :  { %384 = vmatprep.subr.bf16.mxu0 %v509_v0  ;;  %404 = vmatprep.subr.bf16.mxu1 %v509_v0 }
  0x54   :  { %385 = vmatpush3.bf16.msra.mxu0 %v424_v13  ;;  %405 = vmatpush3.bf16.msra.mxu1 %v433_v17 }
  0x57   :  { %387 = vmatmul.mubr.bf16.vlgmr.msra.gmra.mrb[0].mxu0 %v425_v15 }
 0x12a   :  { %v179_v19 = vpop.f32.mrb[0].mxu0 }
 0x12b   :  { %v180_v20 = vadd.f32 %v332_v18, %v179_v19  ;;  %v388_v21 = vpop.f32.mrb[1].mxu0 }
 0x12c   :  { %v182_v22 = vpop.f32.mrb[2].mxu0 }
 0x12d   :  { %v183_v23 = vadd.f32 %v332_v18, %v182_v22  ;;  %v389_v24 = vpop.f32.mrb[3].mxu0  ;;  %v186_v25 = vmax.f32 %v180_v20, 0.0 }
 0x12f   :  { %v187_v26 = vmax.f32 %v183_v23, 0.0 }
 0x131   :  { %v188_v27 = vpack.c.bf16 %v187_v26, %v186_v25 }
 0x133   :  { %407 = vmatmul.mubr.bf16.vlgmr.msra.gmra.mrb[0].mxu1 %v188_v27 }
 0x206   :  { %v294_v29 = vpop.f32.mrb[0].mxu1 }
 0x207   :  { %v295_v30 = vadd.f32 %v342_v28, %v294_v29  ;;  %v408_v31 = vpop.f32.mrb[1].mxu1 }
 0x208   :  { %v297_v32 = vpop.f32.mrb[2].mxu1 }
 0x209   :  { %v298_v33 = vadd.f32 %v342_v28, %v297_v32  ;;  %v409_v34 = vpop.f32.mrb[3].mxu1  ;;  %v301_v35 = vmax.f32 %v295_v30, 0.0 }
 0x20b   :  { %v302_v36 = vmax.f32 %v298_v33, 0.0 }
 0x20d   :  { %v303_v37 = vpack.c.bf16 %v302_v36, %v301_v35 }
 0x20f   :  { %v305_v39 = vunpack.c.l.bf16 %v303_v37  ;;  %v306_v41 = vunpack.c.h.bf16 %v303_v37 }
 0x211   :  { %v313_v40 = vmul.f32 %v351_v38, %v305_v39  ;;  %v314_v42 = vmul.f32 %v351_v38, %v306_v41 }
 0x213   :  { %315 = vadd.xlane.f32.xlu0 %v313_v40 }
 0x217   :  { %317 = vadd.xlane.f32.xlu0 %v314_v42 }
 0x2a0   :  { %v316_v44 = vpop.xlane.xlu0 %315 }
 0x2a1   :  { %v321_v45 = vadd.f32 %v320_v43, %v316_v44 }
 0x2a3   :  { %324 = vst.msk [vmem:[%s622_s6] sm:$0xff] %vm323_vm1, %v321_v45 }
 0x2a4   :  { %v318_v46 = vpop.xlane.xlu0 %317 }
 0x2a5   :  { %v322_v47 = vadd.f32 %v320_v43, %v318_v46 }
 0x2a7   :  { %325 = vst.msk [vmem:[%s622_s6 + $0x8] sm:$0xff] %vm323_vm1, %v322_v47 }
 0x2a8   :  { %330 = vsyncpa [#allocation4], 1 }
 0x2a9   :  { %331 = vsyncpa [#allocation6], 1 }

</bundles_post_ra>
